<compile_context>
chip_gen: v7x
topology: tpu7x:2x2x1
jax: 0.10.0
libtpu: 0.0.40
codegen_flags: <defaults>
</compile_context>

<pallas_src>
import functools

import jax
import jax.numpy as jnp
from jax.experimental import pallas as pl
from jax.experimental.pallas import tpu as pltpu


# --------------------------------------------------------------------------
# Kernel
# --------------------------------------------------------------------------
def _mlp_kernel(x_ref, w1_ref, b1_ref, w2_ref, b2_ref, o_ref):
    """Fused Linear -> ReLU -> Linear -> Sigmoid on one batch tile.

    x_ref : (tb, F)    w1_ref : (F, F)   b1_ref : (1, F)
    w2_ref: (F, O)     b2_ref : (1, O)   o_ref  : (tb, O)
    """
    # TODO(synk): nn.Dropout is stochastic / training-only; eval-mode identity here.
    x = x_ref[...].astype(jnp.float32)

    # Hidden layer: MXU matmul with f32 accumulation, bias add + ReLU on the VPU.
    h = jnp.dot(x, w1_ref[...], preferred_element_type=jnp.float32) + b1_ref[...]
    h = jnp.maximum(h, 0.0)

    # Output layer + sigmoid (EUP).
    y = jnp.dot(h, w2_ref[...], preferred_element_type=jnp.float32) + b2_ref[...]
    o_ref[...] = jax.nn.sigmoid(y).astype(o_ref.dtype)


# --------------------------------------------------------------------------
# Wrapper
# --------------------------------------------------------------------------
def mlp_forward(x, w1, b1, w2, b2):
    """x: (B, F); w1: (F, F); b1: (1, F); w2: (F, O); b2: (1, O) -> (B, O)."""
    B, F = x.shape
    O = w2.shape[1]

    # Pad batch to a sublane multiple so the batch tile satisfies the (8, 128)
    # block-shape constraint; padded rows are sliced off afterwards.
    Bp = pl.cdiv(B, 8) * 8
    if Bp != B:
        x = jnp.pad(x, ((0, Bp - B), (0, 0)))

    # Batch tile: as large as reasonable (fewer grid steps), capped at 128 rows.
    tb = min(Bp, 128)
    grid = (Bp // tb,)

    cost = pl.CostEstimate(
        flops=2 * Bp * F * F + 2 * Bp * F * O,
        transcendentals=Bp * O,                      # sigmoid
        bytes_accessed=4 * (Bp * F + F * F + F + F * O + O + Bp * O),
    )

    out = pl.pallas_call(
        _mlp_kernel,
        out_shape=jax.ShapeDtypeStruct((Bp, O), jnp.float32),
        grid=grid,
        in_specs=[
            pl.BlockSpec((tb, F), lambda i: (i, 0)),   # x  : tiled over batch
            pl.BlockSpec((F, F), lambda i: (0, 0)),    # w1 : resident
            pl.BlockSpec((1, F), lambda i: (0, 0)),    # b1
            pl.BlockSpec((F, O), lambda i: (0, 0)),    # w2
            pl.BlockSpec((1, O), lambda i: (0, 0)),    # b2
        ],
        out_specs=pl.BlockSpec((tb, O), lambda i: (i, 0)),
        compiler_params=pltpu.CompilerParams(
            dimension_semantics=("parallel",),         # shard batch tiles across TCs (v7x)
        ),
        cost_estimate=cost,
    )(x, w1, b1, w2, b2)

    return out[:B]


# --------------------------------------------------------------------------
# Demo / self-test
# --------------------------------------------------------------------------
if __name__ == "__main__":
    # Shapes consistent with the module's use in PJFFF: input_size = 2*hd*8 = 256,
    # output_size = 1, dropout = 0.0 (eval-mode identity).
    B, F, O = 2, 256, 1

    key = jax.random.PRNGKey(0)
    kx, k1, k2, k3, k4 = jax.random.split(key, 5)
    x = jax.random.normal(kx, (B, F), jnp.float32)
    w1 = 0.05 * jax.random.normal(k1, (F, F), jnp.float32)   # Linear(F, F), pre-transposed (in, out)
    b1 = 0.05 * jax.random.normal(k2, (1, F), jnp.float32)
    w2 = 0.05 * jax.random.normal(k3, (F, O), jnp.float32)   # Linear(F, O), pre-transposed (in, out)
    b2 = 0.05 * jax.random.normal(k4, (1, O), jnp.float32)

    fwd = jax.jit(mlp_forward)
    out = fwd(x, w1, b1, w2, b2)
    jax.block_until_ready(out)

    # Pure-JAX reference (same eval-mode semantics).
    ref = jax.nn.sigmoid(jnp.maximum(x @ w1 + b1, 0.0) @ w2 + b2)

    assert out.shape == (B, O)
    assert bool(jnp.all(jnp.isfinite(out)))
    assert bool(jnp.allclose(out, ref, atol=1e-5, rtol=1e-5))
    print("KERNEL_OK")
</pallas_src>

<mosaic_0001>
module attributes {stable_mosaic.version = 11 : i64} {
  func.func @_mlp_kernel(%arg0: i32, %arg1: memref<8x256xf32, #tpu.memory_space<vmem>>, %arg2: memref<256x256xf32, #tpu.memory_space<vmem>>, %arg3: memref<1x256xf32, #tpu.memory_space<vmem>>, %arg4: memref<256x1xf32, #tpu.memory_space<vmem>>, %arg5: memref<1x1xf32, #tpu.memory_space<vmem>>, %arg6: memref<8x1xf32, #tpu.memory_space<vmem>>) attributes {dimension_semantics = [#tpu.dimension_semantics<parallel>], iteration_bounds = array<i64: 1>, scalar_prefetch = 0 : i64, scratch_operands = 0 : i64, tpu.core_type = #tpu.core_type<tc>, window_params = [{transform_indices = @transform_0, window_bounds = array<i64: 8, 256>}, {pipeline_mode = #tpu.pipeline_mode<synchronous>, transform_indices = @transform_1, window_bounds = array<i64: 256, 256>}, {pipeline_mode = #tpu.pipeline_mode<synchronous>, transform_indices = @transform_2, window_bounds = array<i64: 1, 256>}, {pipeline_mode = #tpu.pipeline_mode<synchronous>, transform_indices = @transform_3, window_bounds = array<i64: 256, 1>}, {pipeline_mode = #tpu.pipeline_mode<synchronous>, transform_indices = @transform_4, window_bounds = array<i64: 1, 1>}, {transform_indices = @transform_5, window_bounds = array<i64: 8, 1>}]} {
    %c0 = arith.constant 0 : index
    %c0_0 = arith.constant 0 : index
    %0 = vector.load %arg1[%c0, %c0_0] : memref<8x256xf32, #tpu.memory_space<vmem>>, vector<8x256xf32>
    %c0_1 = arith.constant 0 : index
    %c0_2 = arith.constant 0 : index
    %1 = vector.load %arg2[%c0_1, %c0_2] : memref<256x256xf32, #tpu.memory_space<vmem>>, vector<256x256xf32>
    %cst = arith.constant dense<0.000000e+00> : vector<8x256xf32>
    %2 = tpu.matmul %0, %1, %cst {dimension_numbers = #tpu.dot_dimension_numbers<[1], [0], [0], [1], [0, 0, 1, 1], [], []>} : vector<8x256xf32>, vector<256x256xf32>, vector<8x256xf32> -> vector<8x256xf32>
    %c0_3 = arith.constant 0 : index
    %c0_4 = arith.constant 0 : index
    %3 = vector.load %arg3[%c0_3, %c0_4] : memref<1x256xf32, #tpu.memory_space<vmem>>, vector<1x256xf32>
    %4 = vector.broadcast %3 : vector<1x256xf32> to vector<8x256xf32>
    %5 = arith.addf %2, %4 : vector<8x256xf32>
    %cst_5 = arith.constant 0.000000e+00 : f32
    %6 = vector.broadcast %cst_5 : f32 to vector<8x256xf32>
    %7 = arith.maximumf %5, %6 : vector<8x256xf32>
    %c0_6 = arith.constant 0 : index
    %c0_7 = arith.constant 0 : index
    %8 = vector.load %arg4[%c0_6, %c0_7] : memref<256x1xf32, #tpu.memory_space<vmem>>, vector<256x1xf32>
    %cst_8 = arith.constant dense<0.000000e+00> : vector<8x1xf32>
    %9 = tpu.matmul %7, %8, %cst_8 {dimension_numbers = #tpu.dot_dimension_numbers<[1], [0], [0], [1], [0, 0, 1, 1], [], []>} : vector<8x256xf32>, vector<256x1xf32>, vector<8x1xf32> -> vector<8x1xf32>
    %c0_9 = arith.constant 0 : index
    %c0_10 = arith.constant 0 : index
    %10 = vector.load %arg5[%c0_9, %c0_10] : memref<1x1xf32, #tpu.memory_space<vmem>>, vector<1x1xf32>
    %11 = vector.broadcast %10 : vector<1x1xf32> to vector<8x1xf32>
    %12 = arith.addf %9, %11 : vector<8x1xf32>
    %13 = arith.negf %12 : vector<8x1xf32>
    %14 = math.exp %13 : vector<8x1xf32>
    %cst_11 = arith.constant 1.000000e+00 : f32
    %15 = vector.broadcast %cst_11 : f32 to vector<8x1xf32>
    %16 = arith.addf %15, %14 : vector<8x1xf32>
    %17 = arith.divf %15, %16 : vector<8x1xf32>
    %c0_12 = arith.constant 0 : index
    %c0_13 = arith.constant 0 : index
    %18 = vector.load %arg6[%c0_12, %c0_13] : memref<8x1xf32, #tpu.memory_space<vmem>>, vector<8x1xf32>
    tpu.vector_store %arg6[%c0_12, %c0_13], %17 {strides = array<i32>} : memref<8x1xf32, #tpu.memory_space<vmem>>, vector<8x1xf32>,
    return
  }
  func.func @transform_0(%arg0: i32) -> (i32, i32) {
    %c0_i32 = arith.constant 0 : i32
    %c0_i32_0 = arith.constant 0 : i32
    return %arg0, %c0_i32 : i32, i32
  }
  func.func @transform_1(%arg0: i32) -> (i32, i32) {
    %c0_i32 = arith.constant 0 : i32
    %c0_i32_0 = arith.constant 0 : i32
    %c0_i32_1 = arith.constant 0 : i32
    return %c0_i32, %c0_i32_0 : i32, i32
  }
  func.func @transform_2(%arg0: i32) -> (i32, i32) {
    %c0_i32 = arith.constant 0 : i32
    %c0_i32_0 = arith.constant 0 : i32
    %c0_i32_1 = arith.constant 0 : i32
    return %c0_i32, %c0_i32_0 : i32, i32
  }
  func.func @transform_3(%arg0: i32) -> (i32, i32) {
    %c0_i32 = arith.constant 0 : i32
    %c0_i32_0 = arith.constant 0 : i32
    %c0_i32_1 = arith.constant 0 : i32
    return %c0_i32, %c0_i32_0 : i32, i32
  }
  func.func @transform_4(%arg0: i32) -> (i32, i32) {
    %c0_i32 = arith.constant 0 : i32
    %c0_i32_0 = arith.constant 0 : i32
    %c0_i32_1 = arith.constant 0 : i32
    return %c0_i32, %c0_i32_0 : i32, i32
  }
  func.func @transform_5(%arg0: i32) -> (i32, i32) {
    %c0_i32 = arith.constant 0 : i32
    %c0_i32_0 = arith.constant 0 : i32
    return %arg0, %c0_i32 : i32, i32
  }
}

</mosaic_0001>

<bundles_post_ra>
// kernel: mlp_forward.1
= control target key start
LH: loop header
LB: loop body
LE: loop exit
PB: predicated region body
PF: predicated region fallthrough
CT: control target
= control target key end

     0   :  { %s629_s0 = inlined_call_operand.vmem [shape: f32[8,256], index: 0, kind: input, shape index: {}]   ;;  %s630_s1 = inlined_call_operand.hbm [shape: f32[256,256], index: 1, kind: input, shape index: {}]   ;;  %s631_s2 = inlined_call_operand.vmem [shape: f32[1,256], index: 2, kind: input, shape index: {}]   ;;  %s632_s3 = inlined_call_operand.vmem [shape: f32[256,1], index: 3, kind: input, shape index: {}]   ;;  %s633_s4 = inlined_call_operand.<no memory space> [shape: f32[1,1], index: 4, kind: input, shape index: {}]   ;;  %s634_s5 = inlined_call_operand.vmem [shape: f32[8,1], index: 5, kind: output, shape index: {}]  }
   0x1   :  { %v10_v0 = vstv %s633_s4 }
   0x2   :  { %11 = vst [vmem:[#allocation2] sm:$0x1] %v10_v0 }
   0x3   :  { %12 = vsyncpa [#allocation4], 0  ;;  %s473_s20 = smov [#allocation3]   ;;  %s449_s24 = scalar_lea.hbm %s630_s1, 8192 }
   0x4   :  { %s20_s21 = sshll.u32 %s473_s20, 4  ;;  %p450_p0 = scmp.ne.s32.totalorder %s630_s1, %s449_s24  ;;  %s21_s21 = int_to_ptr.vmem [resolvable:$true] %s20_s21 }
   0x5   :  { %p453_p1 = scmp.lt.u32.totalorder %s449_s24, %s630_s1 }
   0x7   :  { %p455_p2 = pnand %p453_p1, %p450_p0 }
   0x9   :  { %458 = shalt.err (!%p455_p2)
}
   0xa   :  { %s459_s4 = scalar_lea.vmem %s21_s21, 8192  ;;  %p464_p4 = scmp.lt.s32.totalorder %s21_s21, %s21_s21 }
   0xb   :  { %p460_p3 = scmp.ne.s32.totalorder %s21_s21, %s459_s4  ;;  %p465_p5 = scmp.lt.s32.totalorder %s459_s4, %s459_s4 }
   0xd   :  { %p466_p6 = por %p465_p5, %p464_p4 }
   0xf   :  { %p467_p7 = pnand %p466_p6, %p460_p3 }
  0x11   :  { %470 = shalt.err (!%p467_p7)
}
  0x12   :  { %s474_s29 = smov 256   ;;  %s475_s30 = smov 16  }
  0x13   :  { %26 = dma.hbm_to_vmem [thread:$0]  %s630_s1, 8192, %s21_s21, [#allocation4], %s474_s29, %s474_s29, %s475_s30  }
  0x14   :  { %471 = dma.done.wait [#allocation4], 8192  }
  0x15   :  { %472 = vsyncadd [#allocation4], 4294959104  ;;  %v39_v1 = vld [vmem:[#allocation3 + $0x8] sm:$0xff]  ;;  %v41_v2 = vld [vmem:[#allocation3 + $0x18] sm:$0xff]  ;;  %vm302_vm0 = vcmask 7168  }
  0x16   :  { %v38_v3 = vld [vmem:[#allocation3] sm:$0xff]  ;;  %v346_v4 = vpack.c.bf16 %v41_v2, %v39_v1  ;;  %v40_v5 = vld [vmem:[#allocation3 + $0x10] sm:$0xff]  ;;  %v43_v6 = vld [vmem:[#allocation3 + $0x28] sm:$0xff] }
  0x17   :  { %v45_v7 = vld [vmem:[#allocation3 + $0x38] sm:$0xff]  ;;  %v348_v8 = vpack.c.bf16 %v40_v5, %v38_v3  ;;  %v42_v10 = vld [vmem:[#allocation3 + $0x20] sm:$0xff]  ;;  %v44_v11 = vld [vmem:[#allocation3 + $0x30] sm:$0xff] }
  0x18   :  { %v350_v9 = vpack.c.bf16 %v45_v7, %v43_v6  ;;  %v47_v12 = vld [vmem:[#allocation3 + $0x48] sm:$0xff]  ;;  %347 = vmatprep.subr.bf16.mxu0 %v346_v4  ;;  %v49_v13 = vld [vmem:[#allocation3 + $0x58] sm:$0xff]  ;;  %v352_v14 = vpack.c.bf16 %v44_v11, %v42_v10  ;;  %v46_v16 = vld [vmem:[#allocation3 + $0x40] sm:$0xff] }
  0x19   :  { %349 = vmatpush1.bf16.msra.mxu0 %v348_v8  ;;  %v354_v15 = vpack.c.bf16 %v49_v13, %v47_v12  ;;  %v48_v17 = vld [vmem:[#allocation3 + $0x50] sm:$0xff]  ;;  %v51_v18 = vld [vmem:[#allocation3 + $0x68] sm:$0xff]  ;;  %v53_v19 = vld [vmem:[#allocation3 + $0x78] sm:$0xff] }
  0x1a   :  { %351 = vmatprep.subr.bf16.mxu0 %v350_v9  ;;  %v356_v20 = vpack.c.bf16 %v48_v17, %v46_v16  ;;  %v358_v21 = vpack.c.bf16 %v53_v19, %v51_v18  ;;  %v50_v22 = vld [vmem:[#allocation3 + $0x60] sm:$0xff]  ;;  %v52_v23 = vld [vmem:[#allocation3 + $0x70] sm:$0xff]  ;;  %v55_v24 = vld [vmem:[#allocation3 + $0x88] sm:$0xff] }
  0x1b   :  { %v57_v25 = vld [vmem:[#allocation3 + $0x98] sm:$0xff]  ;;  %v360_v26 = vpack.c.bf16 %v52_v23, %v50_v22  ;;  %v54_v28 = vld [vmem:[#allocation3 + $0x80] sm:$0xff]  ;;  %v56_v29 = vld [vmem:[#allocation3 + $0x90] sm:$0xff] }
  0x1c   :  { %v362_v27 = vpack.c.bf16 %v57_v25, %v55_v24  ;;  %v59_v30 = vld [vmem:[#allocation3 + $0xa8] sm:$0xff]  ;;  %v61_v31 = vld [vmem:[#allocation3 + $0xb8] sm:$0xff]  ;;  %v364_v32 = vpack.c.bf16 %v56_v29, %v54_v28  ;;  %v58_v34 = vld [vmem:[#allocation3 + $0xa0] sm:$0xff] }
  0x1d   :  { %353 = vmatpush1.bf16.msra.mxu0 %v352_v14  ;;  %v366_v33 = vpack.c.bf16 %v61_v31, %v59_v30  ;;  %v60_v35 = vld [vmem:[#allocation3 + $0xb0] sm:$0xff]  ;;  %v63_v36 = vld [vmem:[#allocation3 + $0xc8] sm:$0xff]  ;;  %v65_v37 = vld [vmem:[#allocation3 + $0xd8] sm:$0xff] }
  0x1e   :  { %355 = vmatprep.subr.bf16.mxu0 %v354_v15  ;;  %v368_v38 = vpack.c.bf16 %v60_v35, %v58_v34  ;;  %v62_v39 = vld [vmem:[#allocation3 + $0xc0] sm:$0xff]  ;;  %v64_v40 = vld [vmem:[#allocation3 + $0xd0] sm:$0xff]  ;;  %v370_v41 = vpack.c.bf16 %v65_v37, %v63_v36  ;;  %v67_v42 = vld [vmem:[#allocation3 + $0xe8] sm:$0xff] }
  0x1f   :  { %v69_v43 = vld [vmem:[#allocation3 + $0xf8] sm:$0xff]  ;;  %v37_v44 = vld [vmem:[%s629_s0 + $0x8] sm:$0xff]  ;;  %v205_v50 = vld [vmem:[%s632_s3 + $0x90] sm:$0xff]  ;;  %v372_v52 = vpack.c.bf16 %v64_v40, %v62_v39 }
  0x20   :  { %178 = vmatprep.mubr.f32.mxu0 %v37_v44  ;;  %v203_v45 = vld [vmem:[%s632_s3 + $0x80] sm:$0xff]  ;;  %v204_v46 = vld [vmem:[%s632_s3 + $0x88] sm:$0xff]  ;;  %v206_v51 = vld [vmem:[%s632_s3 + $0x98] sm:$0xff]  ;;  %v374_v58 = vpack.c.bf16 %v69_v43, %v67_v42 }
  0x21   :  { %357 = vmatpush1.bf16.msra.mxu0 %v356_v20  ;;  %v187_v47 = vld [vmem:[%s632_s3] sm:$0xff]  ;;  %v410_v48 = vpack.c.bf16 %v204_v46, %v203_v45  ;;  %v188_v49 = vld [vmem:[%s632_s3 + $0x8] sm:$0xff]  ;;  %v414_v54 = vpack.c.bf16 %v206_v51, %v205_v50  ;;  %v189_v55 = vld [vmem:[%s632_s3 + $0x10] sm:$0xff] }
  0x22   :  { %359 = vmatprep.subr.bf16.mxu0 %v358_v21  ;;  %v412_v53 = vpack.c.bf16 %v188_v49, %v187_v47  ;;  %v190_v56 = vld [vmem:[%s632_s3 + $0x18] sm:$0xff]  ;;  %v207_v57 = vld [vmem:[%s632_s3 + $0xa0] sm:$0xff]  ;;  %v208_v61 = vld [vmem:[%s632_s3 + $0xa8] sm:$0xff] }
  0x23   :  { %v66_v59 = vld [vmem:[#allocation3 + $0xe0] sm:$0xff]  ;;  %v68_v60 = vld [vmem:[#allocation3 + $0xf0] sm:$0xff]  ;;  %411 = vmatprep.subr.bf16.mxu1 %v410_v48  ;;  %v71_v62 = vld [vmem:[#allocation3 + $0x108] sm:$0xff]  ;;  %v416_v0 = vpack.c.bf16 %v190_v56, %v189_v55  ;;  %v418_v1 = vpack.c.bf16 %v208_v61, %v207_v57 }
  0x24   :  { %v73_v63 = vld [vmem:[#allocation3 + $0x118] sm:$0xff]  ;;  %413 = vmatpush3.bf16.msra.mxu1 %v412_v53  ;;  %v192_v3 = vld [vmem:[%s632_s3 + $0x28] sm:$0xff]  ;;  %v376_v4 = vpack.c.bf16 %v68_v60, %v66_v59  ;;  %v209_v5 = vld [vmem:[%s632_s3 + $0xb0] sm:$0xff] }
  0x25   :  { %361 = vmatpush1.bf16.msra.mxu0 %v360_v26  ;;  %415 = vmatprep.subr.bf16.mxu1 %v414_v54  ;;  %v191_v2 = vld [vmem:[%s632_s3 + $0x20] sm:$0xff]  ;;  %v210_v6 = vld [vmem:[%s632_s3 + $0xb8] sm:$0xff]  ;;  %v378_v7 = vpack.c.bf16 %v73_v63, %v71_v62  ;;  %v75_v10 = vld [vmem:[#allocation3 + $0x128] sm:$0xff] }
  0x26   :  { %363 = vmatprep.subr.bf16.mxu0 %v362_v27  ;;  %v70_v8 = vld [vmem:[#allocation3 + $0x100] sm:$0xff]  ;;  %v72_v9 = vld [vmem:[#allocation3 + $0x110] sm:$0xff]  ;;  %v77_v11 = vld [vmem:[#allocation3 + $0x138] sm:$0xff]  ;;  %v420_v12 = vpack.c.bf16 %v192_v3, %v191_v2  ;;  %v422_v13 = vpack.c.bf16 %v210_v6, %v209_v5 }
  0x27   :  { %v193_v14 = vld [vmem:[%s632_s3 + $0x30] sm:$0xff]  ;;  %v194_v15 = vld [vmem:[%s632_s3 + $0x38] sm:$0xff]  ;;  %v380_v16 = vpack.c.bf16 %v72_v9, %v70_v8  ;;  %v211_v17 = vld [vmem:[%s632_s3 + $0xc0] sm:$0xff]  ;;  %v382_v19 = vpack.c.bf16 %v77_v11, %v75_v10 }
  0x28   :  { %417 = vmatpush3.bf16.msra.mxu1 %v416_v0  ;;  %v212_v18 = vld [vmem:[%s632_s3 + $0xc8] sm:$0xff]  ;;  %v76_v21 = vld [vmem:[#allocation3 + $0x130] sm:$0xff]  ;;  %v81_v23 = vld [vmem:[#allocation3 + $0x158] sm:$0xff]  ;;  %v424_v24 = vpack.c.bf16 %v194_v15, %v193_v14 }
  0x29   :  { %365 = vmatpush1.bf16.msra.mxu0 %v364_v32  ;;  %419 = vmatprep.subr.bf16.mxu1 %v418_v1  ;;  %v74_v20 = vld [vmem:[#allocation3 + $0x120] sm:$0xff]  ;;  %v79_v22 = vld [vmem:[#allocation3 + $0x148] sm:$0xff]  ;;  %v426_v25 = vpack.c.bf16 %v212_v18, %v211_v17  ;;  %v214_v30 = vld [vmem:[%s632_s3 + $0xd8] sm:$0xff] }
  0x2a   :  { %367 = vmatprep.subr.bf16.mxu0 %v366_v33  ;;  %v195_v26 = vld [vmem:[%s632_s3 + $0x40] sm:$0xff]  ;;  %v196_v27 = vld [vmem:[%s632_s3 + $0x48] sm:$0xff]  ;;  %v384_v28 = vpack.c.bf16 %v76_v21, %v74_v20  ;;  %v213_v29 = vld [vmem:[%s632_s3 + $0xd0] sm:$0xff]  ;;  %v386_v31 = vpack.c.bf16 %v81_v23, %v79_v22 }
  0x2b   :  { %v78_v32 = vld [vmem:[#allocation3 + $0x140] sm:$0xff]  ;;  %v80_v33 = vld [vmem:[#allocation3 + $0x150] sm:$0xff]  ;;  %v83_v34 = vld [vmem:[#allocation3 + $0x168] sm:$0xff]  ;;  %v428_v36 = vpack.c.bf16 %v196_v27, %v195_v26  ;;  %v430_v37 = vpack.c.bf16 %v214_v30, %v213_v29 }
  0x2c   :  { %421 = vmatpush3.bf16.msra.mxu1 %v420_v12  ;;  %v85_v35 = vld [vmem:[#allocation3 + $0x178] sm:$0xff]  ;;  %v388_v40 = vpack.c.bf16 %v80_v33, %v78_v32  ;;  %v216_v42 = vld [vmem:[%s632_s3 + $0xe8] sm:$0xff]  ;;  %v84_v45 = vld [vmem:[#allocation3 + $0x170] sm:$0xff] }
  0x2d   :  { %369 = vmatpush1.bf16.msra.mxu0 %v368_v38  ;;  %423 = vmatprep.subr.bf16.mxu1 %v422_v13  ;;  %v197_v38 = vld [vmem:[%s632_s3 + $0x50] sm:$0xff]  ;;  %v198_v39 = vld [vmem:[%s632_s3 + $0x58] sm:$0xff]  ;;  %v390_v43 = vpack.c.bf16 %v85_v35, %v83_v34  ;;  %v82_v44 = vld [vmem:[#allocation3 + $0x160] sm:$0xff] }
  0x2e   :  { %371 = vmatprep.subr.bf16.mxu0 %v370_v41  ;;  %v215_v41 = vld [vmem:[%s632_s3 + $0xe0] sm:$0xff]  ;;  %v87_v46 = vld [vmem:[#allocation3 + $0x188] sm:$0xff]  ;;  %v432_v48 = vpack.c.bf16 %v198_v39, %v197_v38  ;;  %v392_v50 = vpack.c.bf16 %v84_v45, %v82_v44  ;;  %v88_v53 = vld [vmem:[#allocation3 + $0x190] sm:$0xff] }
  0x2f   :  { %v89_v47 = vld [vmem:[#allocation3 + $0x198] sm:$0xff]  ;;  %v434_v49 = vpack.c.bf16 %v216_v42, %v215_v41  ;;  %v91_v54 = vld [vmem:[#allocation3 + $0x1a8] sm:$0xff]  ;;  %v92_v59 = vld [vmem:[#allocation3 + $0x1b0] sm:$0xff] }
  0x30   :  { %425 = vmatpush3.bf16.msra.mxu1 %v424_v24  ;;  %v394_v51 = vpack.c.bf16 %v89_v47, %v87_v46  ;;  %v93_v55 = vld [vmem:[#allocation3 + $0x1b8] sm:$0xff]  ;;  %v95_v60 = vld [vmem:[#allocation3 + $0x1c8] sm:$0xff]  ;;  %v94_v0 = vld [vmem:[#allocation3 + $0x1c0] sm:$0xff] }
  0x31   :  { %373 = vmatpush1.bf16.msra.mxu0 %v372_v52  ;;  %427 = vmatprep.subr.bf16.mxu1 %v426_v25  ;;  %v86_v52 = vld [vmem:[#allocation3 + $0x180] sm:$0xff]  ;;  %v398_v57 = vpack.c.bf16 %v93_v55, %v91_v54  ;;  %v97_v61 = vld [vmem:[#allocation3 + $0x1d8] sm:$0xff]  ;;  %v96_v1 = vld [vmem:[#allocation3 + $0x1d0] sm:$0xff] }
  0x32   :  { %375 = vmatprep.subr.bf16.mxu0 %v374_v58  ;;  %v396_v56 = vpack.c.bf16 %v88_v53, %v86_v52  ;;  %v90_v58 = vld [vmem:[#allocation3 + $0x1a0] sm:$0xff]  ;;  %v402_v63 = vpack.c.bf16 %v97_v61, %v95_v60  ;;  %v99_v2 = vld [vmem:[#allocation3 + $0x1e8] sm:$0xff]  ;;  %v101_v3 = vld [vmem:[#allocation3 + $0x1f8] sm:$0xff] }
  0x33   :  { %v400_v62 = vpack.c.bf16 %v92_v59, %v90_v58  ;;  %v406_v5 = vpack.c.bf16 %v101_v3, %v99_v2  ;;  %v98_v6 = vld [vmem:[#allocation3 + $0x1e0] sm:$0xff]  ;;  %v217_v13 = vld [vmem:[%s632_s3 + $0xf0] sm:$0xff]  ;;  %v218_v14 = vld [vmem:[%s632_s3 + $0xf8] sm:$0xff] }
  0x34   :  { %429 = vmatpush3.bf16.msra.mxu1 %v428_v36  ;;  %v36_v9 = vld [vmem:[%s629_s0] sm:$0xff]  ;;  %v200_v11 = vld [vmem:[%s632_s3 + $0x68] sm:$0xff]  ;;  %v438_v15 = vpack.c.bf16 %v218_v14, %v217_v13  ;;  %v202_v17 = vld [vmem:[%s632_s3 + $0x78] sm:$0xff] }
  0x35   :  { %377 = vmatpush1.bf16.msra.mxu0 %v376_v4  ;;  %431 = vmatprep.subr.bf16.mxu1 %v430_v37  ;;  %v404_v4 = vpack.c.bf16 %v96_v1, %v94_v0  ;;  %v199_v10 = vld [vmem:[%s632_s3 + $0x60] sm:$0xff] }
  0x36   :  { %379 = vmatprep.subr.bf16.mxu0 %v378_v7  ;;  %v100_v7 = vld [vmem:[#allocation3 + $0x1f0] sm:$0xff]  ;;  %v436_v12 = vpack.c.bf16 %v200_v11, %v199_v10  ;;  %v102_v22 = vld [vmem:[%s631_s2] sm:$0x3] }
  0x37   :  { %v408_v8 = vpack.c.bf16 %v100_v7, %v98_v6  ;;  %v309_v33 = vld [vmem:[#allocation2] ss:$0 sm:$0xff] }
  0x38   :  { %433 = vmatpush3.bf16.msra.mxu1 %v432_v48 }
  0x39   :  { %381 = vmatpush1.bf16.msra.mxu0 %v380_v16  ;;  %435 = vmatprep.subr.bf16.mxu1 %v434_v49  ;;  %v201_v16 = vld [vmem:[%s632_s3 + $0x70] sm:$0xff] }
  0x3a   :  { %383 = vmatprep.subr.bf16.mxu0 %v382_v19  ;;  %v440_v18 = vpack.c.bf16 %v202_v17, %v201_v16  ;;  %v104_v19 = vlaneseq }
  0x3c   :  { %437 = vmatpush3.bf16.msra.mxu1 %v436_v12  ;;  %v105_v20 = vshrl.u32 %v104_v19, 7 }
  0x3d   :  { %385 = vmatpush1.bf16.msra.mxu0 %v384_v28  ;;  %439 = vmatprep.subr.bf16.mxu1 %v438_v15 }
  0x3e   :  { %387 = vmatprep.subr.bf16.mxu0 %v386_v31  ;;  %v106_v21 = vsub.s32 0, %v105_v20  ;;  %v110_v23 = vsub.s32 1, %v105_v20 }
  0x40   :  { %441 = vmatpush3.bf16.msra.mxu1 %v440_v18  ;;  %v107_v24 = vrot.slane %v102_v22, %v106_v21  ;;  %v111_v25 = vrot.slane %v102_v22, %v110_v23 }
  0x41   :  { %389 = vmatpush1.bf16.msra.mxu0 %v388_v40 }
  0x42   :  { %391 = vmatprep.subr.bf16.mxu0 %v390_v43 }
  0x45   :  { %393 = vmatpush1.bf16.msra.mxu0 %v392_v50 }
  0x46   :  { %395 = vmatprep.subr.bf16.mxu0 %v394_v51 }
  0x49   :  { %397 = vmatpush1.bf16.msra.mxu0 %v396_v56 }
  0x4a   :  { %399 = vmatprep.subr.bf16.mxu0 %v398_v57 }
  0x4d   :  { %401 = vmatpush1.bf16.msra.mxu0 %v400_v62 }
  0x4e   :  { %403 = vmatprep.subr.bf16.mxu0 %v402_v63 }
  0x51   :  { %405 = vmatpush1.bf16.msra.mxu0 %v404_v4 }
  0x52   :  { %407 = vmatprep.subr.bf16.mxu0 %v406_v5 }
  0x55   :  { %409 = vmatpush1.bf16.msra.mxu0 %v408_v8 }
  0x58   :  { %179 = vmatmul.mubr.f32.vlgmr.msra.gmra.mrb[0].mxu0 %v36_v9 }
 0x12b   :  { %v180_v26 = vpop.f32.mrb[0].mxu0 }
 0x12c   :  { %v181_v27 = vadd.f32 %v180_v26, %v107_v24  ;;  %v182_v28 = vpop.f32.mrb[1].mxu0 }
 0x12d   :  { %v183_v29 = vadd.f32 %v182_v28, %v111_v25 }
 0x12e   :  { %v185_v31 = vmax.f32 %v181_v27, 0.0 }
 0x12f   :  { %v186_v30 = vmax.f32 %v183_v29, 0.0 }
 0x131   :  { %290 = vmatprep.mubr.f32.mxu1 %v186_v30 }
 0x132   :  { %291 = vmatmul.mubr.f32.vlgmr.msra.gmra.mrb[0].mxu1 %v185_v31 }
 0x205   :  { %v343_v32 = vpop.f32.mrb[0].mxu1 }
 0x206   :  { %v344_v34 = vpop.f32.mrb[1].mxu1 }
 0x207   :  { %v345_v35 = vadd.f32 %v344_v34, %v343_v32 }
 0x209   :  { %v293_v36 = vadd.f32 %v345_v35, %v309_v33 }
 0x20b   :  { %v310_v37 = vmul.f32 -1.442695, %v293_v36 }
 0x20d   :  { %445 = vpow2.f32 %v310_v37 }
 0x217   :  { %v446_v38 = vpop.eup %445 }
 0x218   :  { %v299_v39 = vadd.f32 1.0, %v446_v38 }
 0x21a   :  { %447 = vrcp.f32 %v299_v39 }
 0x224   :  { %v448_v40 = vpop.eup %447 }
 0x225   :  { %303 = vst.msk [vmem:[%s634_s5] sm:$0xff] %vm302_vm0, %v448_v40 }
 0x226   :  { %308 = vsyncpa [#allocation4], 1 }

</bundles_post_ra>
